<compile_context>
chip_gen: v7x
topology: tpu7x:2x2x1
jax: 0.10.0
libtpu: 0.0.40
codegen_flags: <defaults>
</compile_context>

<pallas_src>
import jax
import jax.numpy as jnp
from jax.experimental import pallas as pl
from jax.experimental.pallas import tpu as pltpu


def _dma_copy_kernel(x_ref, o_ref, sem):
    # x_ref / o_ref are raw HBM refs (memory_space=pl.ANY): one direct
    # HBM->HBM DMA of the full contiguous buffer, no VMEM staging.
    cp = pltpu.make_async_copy(x_ref, o_ref, sem)
    cp.start()
    cp.wait()


def _materialized_flatten(x2d: jax.Array) -> jax.Array:
    """Produce a fresh (N, flat) buffer via a single HBM->HBM DMA."""
    n, flat = x2d.shape
    itemsize = jnp.dtype(x2d.dtype).itemsize
    return pl.pallas_call(
        _dma_copy_kernel,
        out_shape=jax.ShapeDtypeStruct((n, flat), x2d.dtype),
        in_specs=[pl.BlockSpec(memory_space=pl.ANY)],
        out_specs=pl.BlockSpec(memory_space=pl.ANY),
        scratch_shapes=[pltpu.SemaphoreType.DMA],
        cost_estimate=pl.CostEstimate(
            flops=0,
            transcendentals=0,
            bytes_accessed=2 * n * flat * itemsize,
        ),
    )(x2d)


def lin_view(x: jax.Array, materialize: bool = False) -> jax.Array:
    """Flatten all dims after the batch dim: (N, ...) -> (N, prod(...)).

    materialize=False (default): metadata-only reshape, identical semantics to
    torch's x.view(x.size(0), -1) on a contiguous tensor — no kernel, no HBM
    traffic.
    materialize=True: additionally force a fresh output buffer via a Pallas
    HBM->HBM DMA copy kernel.
    """
    n = x.shape[0]
    flat = 1
    for d in x.shape[1:]:
        flat *= d

    # Metadata-only flatten (row-major, == torch .view on contiguous input).
    x2d = jnp.reshape(x, (n, flat))

    if not materialize:
        return x2d

    return _materialized_flatten(x2d)


if __name__ == "__main__":
    key = jax.random.PRNGKey(0)
    # Small NCHW input consistent with a conv feature map feeding Lin_View.
    N, C, H, W = 2, 4, 16, 16
    x = jax.random.normal(key, (N, C, H, W), dtype=jnp.float32)

    # Default (fast) path: metadata-only flatten — exactly torch's .view.
    y_view = lin_view(x)

    # Materialized path: exercises the Pallas HBM->HBM DMA copy kernel.
    y_copy = lin_view(x, materialize=True)
    jax.block_until_ready(y_copy)

    # Reference: torch's x.view(x.size(0), -1) == row-major reshape.
    y_ref = jnp.reshape(x, (N, C * H * W))
    assert y_view.shape == (N, C * H * W), y_view.shape
    assert y_copy.shape == (N, C * H * W), y_copy.shape
    assert y_copy.dtype == x.dtype
    assert jnp.array_equal(y_view, y_ref), "view path mismatch vs reference"
    assert jnp.array_equal(y_copy, y_ref), "copy path mismatch vs reference"

    print("KERNEL_OK")
</pallas_src>

<mosaic_0001>
module attributes {stable_mosaic.version = 11 : i64} {
  func.func @_dma_copy_kernel(%arg0: memref<2x1024xf32, #tpu.memory_space<any>>, %arg1: memref<2x1024xf32, #tpu.memory_space<any>>, %arg2: memref<!tpu.dma_semaphore, #tpu.memory_space<semaphore_mem>>) attributes {dimension_semantics = [], scalar_prefetch = 0 : i64, scratch_operands = 1 : i64, tpu.core_type = #tpu.core_type<tc>} {
    tpu.enqueue_dma source(%arg0 : memref<2x1024xf32, #tpu.memory_space<any>>) target(%arg1 : memref<2x1024xf32, #tpu.memory_space<any>>) target_semaphore(%arg2 : memref<!tpu.dma_semaphore, #tpu.memory_space<semaphore_mem>>)
    tpu.wait_dma2 semaphore(%arg2 : memref<!tpu.dma_semaphore, #tpu.memory_space<semaphore_mem>>) src(%arg0 : memref<2x1024xf32, #tpu.memory_space<any>>) dst(%arg1 : memref<2x1024xf32, #tpu.memory_space<any>>)
    return
  }
}

</mosaic_0001>

<bundles_post_ra>
// kernel: tpu_custom_call.1
= control target key start
LH: loop header
LB: loop body
LE: loop exit
PB: predicated region body
PF: predicated region fallthrough
CT: control target
= control target key end

     0   :  { %s35_s6 = smov [#allocation2]   ;;  %s36_s7 = smov [#allocation3]   ;;  %s54_s0 = inlined_call_operand.hbm [shape: f32[2,1024], index: 0, kind: input, shape index: {}]   ;;  %s55_s1 = inlined_call_operand.hbm [shape: f32[2,1024], index: 1, kind: output, shape index: {}]  }
   0x1   :  { %s37_s8 = smov 0  }
   0x2   :  { %18 = dma.general %s54_s0, 256, %s55_s1, %s35_s6, %s36_s7, [#allocation4], %s37_s8, 0  }
   0x3   :  { %33 = dma.done.wait [#allocation2], 256 }
   0x4   :  { %34 = vsyncadd [#allocation2], 4294967040 }
   0x5   :  { %23 = vsyncmov [#allocation2] }
   0x8   :  { %s24_s13 = vpop.sfrf %23 }
   0x9   :  { %p29_p0 = scmp.ne.s32.totalorder %s24_s13, 0 }
   0xb   :  { %28 = shalt.err (%p29_p0)  }

</bundles_post_ra>
